<compile_context>
chip_gen: v6e
topology: v6e:2x2x1
jax: 0.10.0
libtpu: 0.0.40
codegen_flags: <defaults>
</compile_context>

<pallas_src>
import functools

import jax
import jax.numpy as jnp
from jax.experimental import pallas as pl
from jax.experimental.pallas import tpu as pltpu


def _rmsnorm_kernel(x_ref, w_ref, b_ref, o_ref, *, eps, inv_d):
    # x_ref: (block_rows, d_model_padded) in VMEM
    x = x_ref[...].astype(jnp.float32)
    # Sum of squares over the feature (lane) axis, divided by the TRUE d_model
    # so zero-padded feature columns do not perturb the statistic.
    ms = jnp.sum(x * x, axis=-1, keepdims=True) * inv_d
    inv_rms = jax.lax.rsqrt(ms + eps)
    y = x * inv_rms
    w = w_ref[...].astype(jnp.float32)   # (1, d_model_padded)
    b = b_ref[...].astype(jnp.float32)   # (1, d_model_padded)
    o_ref[...] = (y * w + b).astype(o_ref.dtype)


def _choose_block_rows(rows, d_model_p, itemsize):
    """Pick the largest row tile that fits a conservative VMEM budget."""
    # sublane packing: 8 rows for 32-bit, 16 for 16-bit, 32 for 8-bit dtypes
    mult = max(8, 32 // max(1, itemsize))
    # VMEM per block row: 2x double-buffered input + 2x double-buffered output
    # (in the source dtype) + ~3 f32-sized temporaries for the upcast math.
    per_row = d_model_p * (4 * itemsize + 3 * 4)
    budget = 44 * 1024 * 1024  # headroom inside v7x's 64 MiB physical VMEM
    br = (budget // per_row) // mult * mult
    br = int(max(mult, min(br, 1024)))
    # Never make the block much larger than the whole problem.
    rows_rounded = (rows + mult - 1) // mult * mult
    return min(br, max(mult, rows_rounded))


def rmsnorm(x, weight, bias, eps=1e-5, block_rows=None):
    """RMSNorm over the last axis of x. x: (..., d_model)."""
    orig_shape = x.shape
    d_model = orig_shape[-1]
    x2d = x.reshape(-1, d_model)
    rows = x2d.shape[0]
    itemsize = jnp.dtype(x.dtype).itemsize

    # Lane-dense feature axis: pad to a multiple of 128 only if necessary.
    feat_pad = (-d_model) % 128
    d_model_p = d_model + feat_pad
    if feat_pad:
        x2d = jnp.pad(x2d, ((0, 0), (0, feat_pad)))
        weight = jnp.pad(weight, (0, feat_pad))
        bias = jnp.pad(bias, (0, feat_pad))

    w2d = weight.reshape(1, d_model_p)
    b2d = bias.reshape(1, d_model_p)

    if block_rows is None:
        block_rows = _choose_block_rows(rows, d_model_p, itemsize)

    # Scoped-VMEM limit sized to the chosen tile (double-buffered in/out + f32
    # temporaries + weight/bias + margin), capped below v7x's 64 MiB physical.
    per_row = d_model_p * (4 * itemsize + 3 * 4)
    vmem_limit = int(min(60 * 1024 * 1024,
                         max(16 * 1024 * 1024,
                             block_rows * per_row + 4 * d_model_p * 4 + (4 << 20))))

    # Ragged tail block is handled by Pallas: no row pad / output slice passes.
    grid = (pl.cdiv(rows, block_rows),)

    kernel = functools.partial(
        _rmsnorm_kernel, eps=float(eps), inv_d=1.0 / float(d_model))

    out = pl.pallas_call(
        kernel,
        out_shape=jax.ShapeDtypeStruct((rows, d_model_p), x.dtype),
        grid_spec=pltpu.PrefetchScalarGridSpec(
            num_scalar_prefetch=0,
            grid=grid,
            in_specs=[
                pl.BlockSpec((block_rows, d_model_p), lambda i: (i, 0)),
                pl.BlockSpec((1, d_model_p), lambda i: (0, 0)),
                pl.BlockSpec((1, d_model_p), lambda i: (0, 0)),
            ],
            out_specs=pl.BlockSpec((block_rows, d_model_p), lambda i: (i, 0)),
        ),
        compiler_params=pltpu.CompilerParams(
            dimension_semantics=("parallel",),
            vmem_limit_bytes=vmem_limit,
        ),
    )(x2d, w2d, b2d)

    if feat_pad:
        out = out[:, :d_model]
    return out.reshape(orig_shape)


if __name__ == "__main__":
    eps = 1e-5

    def ref_rmsnorm(x, w, b):
        xf = x.astype(jnp.float32)
        ms = jnp.mean(xf * xf, axis=-1, keepdims=True)
        y = xf * jax.lax.rsqrt(ms + eps)
        return (y * w + b).astype(x.dtype)

    # Case 1: lane-dense d_model (multiple of 128) — the zero-copy fast path.
    # Parameters match nn.Parameter(torch.ones/zeros(d_model)).
    key = jax.random.PRNGKey(0)
    batch, seq, d_model = 2, 8, 128
    x = jax.random.normal(key, (batch, seq, d_model), dtype=jnp.float32)
    weight = jnp.ones((d_model,), dtype=jnp.float32)
    bias = jnp.zeros((d_model,), dtype=jnp.float32)

    y = jax.block_until_ready(rmsnorm(x, weight, bias, eps=eps))
    assert jnp.allclose(y, ref_rmsnorm(x, weight, bias), atol=1e-5, rtol=1e-5), \
        "mismatch vs reference (aligned case)"

    # Case 2: non-128-aligned d_model + ragged row count — exercises the
    # feature-pad path and the Pallas-handled partial tail block.
    k1, k2, k3 = jax.random.split(jax.random.PRNGKey(0), 3)
    x2 = jax.random.normal(k1, (1, 13, 96), dtype=jnp.float32)
    w2 = jax.random.normal(k2, (96,), dtype=jnp.float32)
    b2 = jax.random.normal(k3, (96,), dtype=jnp.float32)

    y2 = jax.block_until_ready(rmsnorm(x2, w2, b2, eps=eps))
    assert jnp.allclose(y2, ref_rmsnorm(x2, w2, b2), atol=1e-5, rtol=1e-5), \
        "mismatch vs reference (padded/ragged case)"

    print("KERNEL_OK")
</pallas_src>

<mosaic_0001>
module attributes {stable_mosaic.version = 11 : i64} {
  func.func @_rmsnorm_kernel(%arg0: i32, %arg1: memref<16x128xf32, #tpu.memory_space<vmem>>, %arg2: memref<1x128xf32, #tpu.memory_space<vmem>>, %arg3: memref<1x128xf32, #tpu.memory_space<vmem>>, %arg4: memref<16x128xf32, #tpu.memory_space<vmem>>) attributes {dimension_semantics = [#tpu.dimension_semantics<parallel>], iteration_bounds = array<i64: 1>, scalar_prefetch = 0 : i64, scratch_operands = 0 : i64, tpu.core_type = #tpu.core_type<tc>, window_params = [{transform_indices = @transform_0, window_bounds = array<i64: 16, 128>}, {pipeline_mode = #tpu.pipeline_mode<synchronous>, transform_indices = @transform_1, window_bounds = array<i64: 1, 128>}, {pipeline_mode = #tpu.pipeline_mode<synchronous>, transform_indices = @transform_2, window_bounds = array<i64: 1, 128>}, {transform_indices = @transform_3, window_bounds = array<i64: 16, 128>}]} {
    %c0 = arith.constant 0 : index
    %c0_0 = arith.constant 0 : index
    %0 = vector.load %arg1[%c0, %c0_0] : memref<16x128xf32, #tpu.memory_space<vmem>>, vector<16x128xf32>
    %1 = arith.mulf %0, %0 : vector<16x128xf32>
    %cst = arith.constant dense<0.000000e+00> : vector<16xf32>
    %2 = vector.multi_reduction <add>, %1, %cst [1] : vector<16x128xf32> to vector<16xf32>
    %3 = vector.shape_cast %2 : vector<16xf32> to vector<16x1xf32>
    %cst_1 = arith.constant 7.812500e-03 : f32
    %4 = vector.broadcast %cst_1 : f32 to vector<16x1xf32>
    %5 = arith.mulf %3, %4 : vector<16x1xf32>
    %cst_2 = arith.constant 9.99999974E-6 : f32
    %6 = vector.broadcast %cst_2 : f32 to vector<16x1xf32>
    %7 = arith.addf %5, %6 : vector<16x1xf32>
    %8 = math.rsqrt %7 : vector<16x1xf32>
    %9 = vector.broadcast %8 : vector<16x1xf32> to vector<16x128xf32>
    %10 = arith.mulf %0, %9 : vector<16x128xf32>
    %c0_3 = arith.constant 0 : index
    %c0_4 = arith.constant 0 : index
    %11 = vector.load %arg2[%c0_3, %c0_4] : memref<1x128xf32, #tpu.memory_space<vmem>>, vector<1x128xf32>
    %c0_5 = arith.constant 0 : index
    %c0_6 = arith.constant 0 : index
    %12 = vector.load %arg3[%c0_5, %c0_6] : memref<1x128xf32, #tpu.memory_space<vmem>>, vector<1x128xf32>
    %13 = vector.broadcast %11 : vector<1x128xf32> to vector<16x128xf32>
    %14 = arith.mulf %10, %13 : vector<16x128xf32>
    %15 = vector.broadcast %12 : vector<1x128xf32> to vector<16x128xf32>
    %16 = arith.addf %14, %15 : vector<16x128xf32>
    %c0_7 = arith.constant 0 : index
    %c0_8 = arith.constant 0 : index
    %17 = vector.load %arg4[%c0_7, %c0_8] : memref<16x128xf32, #tpu.memory_space<vmem>>, vector<16x128xf32>
    tpu.vector_store %arg4[%c0_7, %c0_8], %16 {strides = array<i32>} : memref<16x128xf32, #tpu.memory_space<vmem>>, vector<16x128xf32>,
    return
  }
  func.func @transform_0(%arg0: i32) -> (i32, i32) {
    %c0_i32 = arith.constant 0 : i32
    %c0_i32_0 = arith.constant 0 : i32
    return %arg0, %c0_i32 : i32, i32
  }
  func.func @transform_1(%arg0: i32) -> (i32, i32) {
    %c0_i32 = arith.constant 0 : i32
    %c0_i32_0 = arith.constant 0 : i32
    %c0_i32_1 = arith.constant 0 : i32
    return %c0_i32, %c0_i32_0 : i32, i32
  }
  func.func @transform_2(%arg0: i32) -> (i32, i32) {
    %c0_i32 = arith.constant 0 : i32
    %c0_i32_0 = arith.constant 0 : i32
    %c0_i32_1 = arith.constant 0 : i32
    return %c0_i32, %c0_i32_0 : i32, i32
  }
  func.func @transform_3(%arg0: i32) -> (i32, i32) {
    %c0_i32 = arith.constant 0 : i32
    %c0_i32_0 = arith.constant 0 : i32
    return %arg0, %c0_i32 : i32, i32
  }
}

</mosaic_0001>

<bundles_post_ra>
// kernel: tpu_custom_call.1
= control target key start
LH: loop header
LB: loop body
LE: loop exit
PB: predicated region body
PF: predicated region fallthrough
CT: control target
= control target key end

     0   :  { %8 = vsyncpa [#allocation3], 0  ;;  %s178_s0 = inlined_call_operand.hbm [shape: f32[16,128], index: 0, kind: input, shape index: {}]   ;;  %s179_s1 = inlined_call_operand.vmem [shape: f32[1,128], index: 1, kind: input, shape index: {}]   ;;  %s180_s2 = inlined_call_operand.vmem [shape: f32[1,128], index: 2, kind: input, shape index: {}]   ;;  %s181_s3 = inlined_call_operand.hbm [shape: f32[16,128], index: 3, kind: output, shape index: {}]  }
   0x1   :  { %9 = vsyncpa [#allocation4], 0  ;;  %s136_s12 = smov [#allocation2]  }
   0x2   :  { %s15_s13 = sshll.u32 %s136_s12, 4  ;;  %s16_s13 = int_to_ptr.vmem [resolvable:$true] %s15_s13 }
   0x3   :  { %s100_s14 = scalar_lea.vmem %s16_s13, 256  ;;  %p105_p1 = scmp.lt.s32.totalorder %s16_s13, %s16_s13 }
   0x4   :  { %p101_p0 = scmp.ne.s32.totalorder %s16_s13, %s100_s14  ;;  %p106_p2 = scmp.lt.s32.totalorder %s100_s14, %s100_s14 }
   0x6   :  { %p107_p3 = por %p106_p2, %p105_p1 }
   0x8   :  { %p108_p4 = pnand %p107_p3, %p101_p0 }
   0xa   :  { %111 = shalt.err (!%p108_p4)
}
   0xb   :  { %s137_s15 = smov 128   ;;  %s138_s16 = smov 8  }
   0xc   :  { %21 = dma.hbm_to_vmem [thread:$0]  %s178_s0, 256, %s16_s13, [#allocation3], %s137_s15, %s137_s15, %s138_s16  }
   0xd   :  { %132 = dma.done.wait [#allocation3], 256  }
   0xe   :  { %133 = vsyncadd [#allocation3], 4294967040  ;;  %v29_v0 = vld [vmem:[#allocation2] sm:$0xff]  ;;  %v30_v1 = vld [vmem:[#allocation2 + $0x8] sm:$0xff]  ;;  %s139_s22 = smov [#allocation5]  }
   0xf   :  { %v31_v2 = vmul.f32 %v29_v0, %v29_v0  ;;  %v32_v3 = vmul.f32 %v30_v1, %v30_v1  ;;  %v82_v11 = vld [vmem:[%s179_s1] ss:$0 sm:$0xff]  ;;  %s70_s23 = sshll.u32 %s139_s22, 4  ;;  %s71_s23 = int_to_ptr.vmem [resolvable:$true] %s70_s23 }
  0x10   :  { %v83_v13 = vld [vmem:[%s180_s2] ss:$0 sm:$0xff]  ;;  %s112_s24 = scalar_lea.vmem %s71_s23, 256  ;;  %p117_p6 = scmp.lt.s32.totalorder %s71_s23, %s71_s23 }
  0x11   :  { %33 = vadd.xlane.f32.xlu0 %v31_v2  ;;  %p113_p5 = scmp.ne.s32.totalorder %s71_s23, %s112_s24  ;;  %p118_p7 = scmp.lt.s32.totalorder %s112_s24, %s112_s24 }
  0x13   :  { %p119_p8 = por %p118_p7, %p117_p6 }
  0x15   :  { %35 = vadd.xlane.f32.xlu0 %v32_v3  ;;  %p120_p9 = pnand %p119_p8, %p113_p5 }
  0x9a   :  { %v34_v4 = vpop.xlane.xlu0 %33 }
  0x9b   :  { %v37_v5 = vmul.f32 0.0078125, %v34_v4 }
  0x9d   :  { %v39_v6 = vadd.f32 1e-05, %v37_v5 }
  0x9e   :  { %v36_v7 = vpop.xlane.xlu0 %35 }
  0x9f   :  { %88 = vrsqrt.f32 %v39_v6  ;;  %v38_v8 = vmul.f32 0.0078125, %v36_v7 }
  0xa1   :  { %v40_v9 = vadd.f32 1e-05, %v38_v8 }
  0xa3   :  { %90 = vrsqrt.f32 %v40_v9 }
  0xac   :  { %v89_v10 = vpop.eup %88 }
  0xad   :  { %v43_v12 = vmul.f32 %v89_v10, %v29_v0 }
  0xaf   :  { %v53_v14 = vmul.f32 %v82_v11, %v43_v12 }
  0xb0   :  { %v91_v15 = vpop.eup %90 }
  0xb1   :  { %v44_v16 = vmul.f32 %v91_v15, %v30_v1  ;;  %v61_v17 = vadd.f32 %v83_v13, %v53_v14 }
  0xb3   :  { %v54_v18 = vmul.f32 %v82_v11, %v44_v16  ;;  %63 = vst [vmem:[#allocation5] sm:$0xff] %v61_v17 }
  0xb5   :  { %v62_v19 = vadd.f32 %v83_v13, %v54_v18 }
  0xb7   :  { %64 = vst [vmem:[#allocation5 + $0x8] sm:$0xff] %v62_v19 }
  0xb8   :  { %123 = shalt.err (!%p120_p9)
}
  0xb9   :  { %76 = dma.vmem_to_hbm [thread:$0]  %s71_s23, 256, %s181_s3, [#allocation4], %s137_s15, %s137_s15, %s138_s16  }
  0xba   :  { %134 = dma.done.wait [#allocation4], 256  }
  0xbb   :  { %135 = vsyncadd [#allocation4], 4294967040 }
  0xbc   :  { %80 = vsyncpa [#allocation3], 1 }
  0xbd   :  { %81 = vsyncpa [#allocation4], 1 }

</bundles_post_ra>
